<compile_context>
chip_gen: v5e
topology: v5e:2x2
jax: 0.10.0
libtpu: 0.0.40
codegen_flags: <defaults>
</compile_context>

<pallas_src>
import functools
import math

import jax
import jax.numpy as jnp
from jax.experimental import pallas as pl
from jax.experimental.pallas import tpu as pltpu


def _round_up(x, m):
    return (x + m - 1) // m * m


def gcn_kernel_2mm(adj_ref, h_ref, wt_ref, b_ref, out_ref, acc_ref):
    """K-tiled aggregation, then linear + bias + ReLU on the last K step.

    adj_ref : (tm, tk)   bf16 adjacency block
    h_ref   : (tk, f_p)  f32 node-feature block (in_feats padded to 128)
    wt_ref  : (f_p, o_p) f32 transposed weight (padded)
    b_ref   : (1, o_p)   f32 bias (padded)
    out_ref : (tm, o_p)
    acc_ref : (tm, f_p)  f32 VMEM accumulator for adj @ H
    """
    k = pl.program_id(1)

    @pl.when(k == 0)
    def _():
        acc_ref[...] = jnp.zeros_like(acc_ref)

    acc_ref[...] += jnp.dot(adj_ref[...].astype(jnp.float32), h_ref[...],
                            preferred_element_type=jnp.float32)

    @pl.when(k == pl.num_programs(1) - 1)
    def _():
        lin = jnp.dot(acc_ref[...], wt_ref[...],
                      preferred_element_type=jnp.float32) + b_ref[...]
        out_ref[...] = jnp.maximum(lin, 0.0).astype(out_ref.dtype)


def gcn_kernel_premul(adj_ref, hw_ref, b_ref, out_ref, acc_ref):
    """Reassociated path: out = relu(adj @ (H @ W.T) + b); HW precomputed outside.

    adj_ref : (tm, tk)   bf16 adjacency block
    hw_ref  : (tk, o_p)  f32 pre-multiplied feature block (out_feats padded)
    b_ref   : (1, o_p)
    out_ref : (tm, o_p)
    acc_ref : (tm, o_p)  f32 VMEM accumulator
    """
    k = pl.program_id(1)

    @pl.when(k == 0)
    def _():
        acc_ref[...] = jnp.zeros_like(acc_ref)

    acc_ref[...] += jnp.dot(adj_ref[...].astype(jnp.float32), hw_ref[...],
                            preferred_element_type=jnp.float32)

    @pl.when(k == pl.num_programs(1) - 1)
    def _():
        out_ref[...] = jnp.maximum(acc_ref[...] + b_ref[...], 0.0).astype(out_ref.dtype)


@functools.partial(jax.jit, static_argnames=("tm", "tk"))
def gcn_layer(adj, h, w, b, *, tm=256, tk=512):
    """out = relu((adj @ h) @ w.T + b), matching GraphConvolutionLayer.forward."""
    n, in_feats = h.shape
    out_feats = w.shape[0]
    assert adj.shape == (n, n)
    assert tm % 128 == 0 and tk % 128 == 0

    out_p = _round_up(out_feats, 128)          # lane-dense output width

    # Reassociation: (A H) W^T == A (H W^T).  When out_feats <= in_feats the
    # pre-multiplied HW matrix is smaller, so feed it and drop the second matmul.
    premul = out_feats <= in_feats
    if premul:
        feat = jnp.dot(h.astype(jnp.float32), w.T.astype(jnp.float32))   # (n, out_feats)
        f_p = out_p
    else:
        feat = h.astype(jnp.float32)
        f_p = _round_up(in_feats, 128)

    # Tile selection: clamp to (padded) N, then pad N so both tiles divide evenly.
    n_pad = _round_up(n, 128)
    tm = min(tm, n_pad)
    tk = min(tk, n_pad)
    lcm = tm * tk // math.gcd(tm, tk)
    n_pad = _round_up(n_pad, lcm)

    # Pad inputs with zeros (padded rows/cols contribute nothing; padded output
    # rows/cols are sliced off).  Adjacency goes to bf16: exact for 0/1 entries,
    # and it is the dominant HBM stream.
    adj_p = jnp.pad(adj.astype(jnp.bfloat16), ((0, n_pad - n), (0, n_pad - n)))
    feat_p = jnp.pad(feat, ((0, n_pad - n), (0, f_p - feat.shape[1])))
    b_p = jnp.pad(b.astype(jnp.float32).reshape(1, out_feats),
                  ((0, 0), (0, out_p - out_feats)))

    grid = (n_pad // tm, n_pad // tk)

    adj_spec = pl.BlockSpec((tm, tk), lambda i, k: (i, k))
    feat_spec = pl.BlockSpec((tk, f_p), lambda i, k: (k, 0))
    b_spec = pl.BlockSpec((1, out_p), lambda i, k: (0, 0))
    out_spec = pl.BlockSpec((tm, out_p), lambda i, k: (i, 0))
    scratch = [pltpu.VMEM((tm, f_p), jnp.float32)]

    compiler_params = pltpu.CompilerParams(
        dimension_semantics=("parallel", "arbitrary"),
        vmem_limit_bytes=48 * 1024 * 1024,   # safe on v7x (64 MiB) and v5e/v6e
    )

    if premul:
        out_padded = pl.pallas_call(
            gcn_kernel_premul,
            out_shape=jax.ShapeDtypeStruct((n_pad, out_p), jnp.float32),
            grid_spec=pltpu.PrefetchScalarGridSpec(
                num_scalar_prefetch=0,
                grid=grid,
                in_specs=[adj_spec, feat_spec, b_spec],
                out_specs=out_spec,
                scratch_shapes=scratch,
            ),
            compiler_params=compiler_params,
        )(adj_p, feat_p, b_p)
    else:
        w_p = jnp.pad(w.T.astype(jnp.float32),
                      ((0, f_p - in_feats), (0, out_p - out_feats)))
        w_spec = pl.BlockSpec((f_p, out_p), lambda i, k: (0, 0))
        out_padded = pl.pallas_call(
            gcn_kernel_2mm,
            out_shape=jax.ShapeDtypeStruct((n_pad, out_p), jnp.float32),
            grid_spec=pltpu.PrefetchScalarGridSpec(
                num_scalar_prefetch=0,
                grid=grid,
                in_specs=[adj_spec, feat_spec, w_spec, b_spec],
                out_specs=out_spec,
                scratch_shapes=scratch,
            ),
            compiler_params=compiler_params,
        )(adj_p, feat_p, w_p, b_p)

    return out_padded[:n, :out_feats].astype(h.dtype)


if __name__ == "__main__":
    key = jax.random.PRNGKey(0)

    def make_inputs(key, n, in_feats, out_feats):
        k_adj, k_h, k_w, k_b = jax.random.split(key, 4)
        # Random 0/1 adjacency (self-loops included).
        adj = (jax.random.uniform(k_adj, (n, n)) < 0.1).astype(jnp.float32)
        adj = jnp.maximum(adj, jnp.eye(n, dtype=jnp.float32))
        h = jax.random.normal(k_h, (n, in_feats), dtype=jnp.float32)
        # nn.Linear default init: U(-1/sqrt(in), 1/sqrt(in)).
        bound = 1.0 / (in_feats ** 0.5)
        w = jax.random.uniform(k_w, (out_feats, in_feats), minval=-bound,
                               maxval=bound, dtype=jnp.float32)
        b = jax.random.uniform(k_b, (out_feats,), minval=-bound, maxval=bound,
                               dtype=jnp.float32)
        return adj, h, w, b

    k1, k2 = jax.random.split(key)

    # Case 1: in_feats < out_feats -> two-matmul kernel (aggregate then linear).
    adj, h, w, b = make_inputs(k1, 128, 32, 64)
    out = jax.block_until_ready(gcn_layer(adj, h, w, b))
    ref = jax.nn.relu((adj @ h) @ w.T + b)
    assert out.shape == ref.shape
    assert jnp.allclose(out, ref, atol=1e-4, rtol=1e-4)

    # Case 2: out_feats <= in_feats and ragged N -> reassociated adj @ (H W^T) kernel.
    adj, h, w, b = make_inputs(k2, 200, 96, 48)
    out = jax.block_until_ready(gcn_layer(adj, h, w, b))
    ref = jax.nn.relu((adj @ h) @ w.T + b)
    assert out.shape == ref.shape
    assert jnp.allclose(out, ref, atol=1e-4, rtol=1e-4)

    print("KERNEL_OK")
</pallas_src>

<mosaic_0001>
module attributes {stable_mosaic.version = 11 : i64} {
  func.func @gcn_kernel_2mm(%arg0: i32, %arg1: i32, %arg2: memref<128x128xbf16, #tpu.memory_space<vmem>>, %arg3: memref<128x128xf32, #tpu.memory_space<vmem>>, %arg4: memref<128x128xf32, #tpu.memory_space<vmem>>, %arg5: memref<1x128xf32, #tpu.memory_space<vmem>>, %arg6: memref<128x128xf32, #tpu.memory_space<vmem>>, %arg7: memref<128x128xf32, #tpu.memory_space<vmem>>) attributes {dimension_semantics = [#tpu.dimension_semantics<parallel>, #tpu.dimension_semantics<arbitrary>], iteration_bounds = array<i64: 1, 1>, scalar_prefetch = 0 : i64, scratch_operands = 1 : i64, tpu.core_type = #tpu.core_type<tc>, window_params = [{transform_indices = @transform_0, window_bounds = array<i64: 128, 128>}, {transform_indices = @transform_1, window_bounds = array<i64: 128, 128>}, {pipeline_mode = #tpu.pipeline_mode<synchronous>, transform_indices = @transform_2, window_bounds = array<i64: 128, 128>}, {pipeline_mode = #tpu.pipeline_mode<synchronous>, transform_indices = @transform_3, window_bounds = array<i64: 1, 128>}, {transform_indices = @transform_4, window_bounds = array<i64: 128, 128>}]} {
    %c0_i32 = arith.constant 0 : i32
    %0 = arith.cmpi eq, %arg1, %c0_i32 : i32
    %1 = arith.extui %0 : i1 to i32
    %c0_i32_0 = arith.constant 0 : i32
    %2 = arith.cmpi ne, %1, %c0_i32_0 : i32
    scf.if %2 {
      %cst_10 = arith.constant 0.000000e+00 : f32
      %13 = vector.broadcast %cst_10 : f32 to vector<128x128xf32>
      %c0_11 = arith.constant 0 : index
      %c0_12 = arith.constant 0 : index
      %14 = vector.load %arg7[%c0_11, %c0_12] : memref<128x128xf32, #tpu.memory_space<vmem>>, vector<128x128xf32>
      tpu.vector_store %arg7[%c0_11, %c0_12], %13 {strides = array<i32>} : memref<128x128xf32, #tpu.memory_space<vmem>>, vector<128x128xf32>,
    } else {
    }
    %c0 = arith.constant 0 : index
    %c0_1 = arith.constant 0 : index
    %3 = vector.load %arg7[%c0, %c0_1] : memref<128x128xf32, #tpu.memory_space<vmem>>, vector<128x128xf32>
    %c0_2 = arith.constant 0 : index
    %c0_3 = arith.constant 0 : index
    %4 = vector.load %arg2[%c0_2, %c0_3] : memref<128x128xbf16, #tpu.memory_space<vmem>>, vector<128x128xbf16>
    %5 = arith.extf %4 : vector<128x128xbf16> to vector<128x128xf32>
    %c0_4 = arith.constant 0 : index
    %c0_5 = arith.constant 0 : index
    %6 = vector.load %arg3[%c0_4, %c0_5] : memref<128x128xf32, #tpu.memory_space<vmem>>, vector<128x128xf32>
    %cst = arith.constant dense<0.000000e+00> : vector<128x128xf32>
    %7 = tpu.matmul %5, %6, %cst {dimension_numbers = #tpu.dot_dimension_numbers<[1], [0], [0], [1], [0, 0, 1, 1], [], []>} : vector<128x128xf32>, vector<128x128xf32>, vector<128x128xf32> -> vector<128x128xf32>
    %8 = arith.addf %3, %7 : vector<128x128xf32>
    %c0_6 = arith.constant 0 : index
    %c0_7 = arith.constant 0 : index
    %9 = vector.load %arg7[%c0_6, %c0_7] : memref<128x128xf32, #tpu.memory_space<vmem>>, vector<128x128xf32>
    tpu.vector_store %arg7[%c0_6, %c0_7], %8 {strides = array<i32>} : memref<128x128xf32, #tpu.memory_space<vmem>>, vector<128x128xf32>,
    %c0_i32_8 = arith.constant 0 : i32
    %10 = arith.cmpi eq, %arg1, %c0_i32_8 : i32
    %11 = arith.extui %10 : i1 to i32
    %c0_i32_9 = arith.constant 0 : i32
    %12 = arith.cmpi ne, %11, %c0_i32_9 : i32
    scf.if %12 {
      %c0_10 = arith.constant 0 : index
      %c0_11 = arith.constant 0 : index
      %13 = vector.load %arg7[%c0_10, %c0_11] : memref<128x128xf32, #tpu.memory_space<vmem>>, vector<128x128xf32>
      %c0_12 = arith.constant 0 : index
      %c0_13 = arith.constant 0 : index
      %14 = vector.load %arg4[%c0_12, %c0_13] : memref<128x128xf32, #tpu.memory_space<vmem>>, vector<128x128xf32>
      %cst_14 = arith.constant dense<0.000000e+00> : vector<128x128xf32>
      %15 = tpu.matmul %13, %14, %cst_14 {dimension_numbers = #tpu.dot_dimension_numbers<[1], [0], [0], [1], [0, 0, 1, 1], [], []>} : vector<128x128xf32>, vector<128x128xf32>, vector<128x128xf32> -> vector<128x128xf32>
      %c0_15 = arith.constant 0 : index
      %c0_16 = arith.constant 0 : index
      %16 = vector.load %arg5[%c0_15, %c0_16] : memref<1x128xf32, #tpu.memory_space<vmem>>, vector<1x128xf32>
      %17 = vector.broadcast %16 : vector<1x128xf32> to vector<128x128xf32>
      %18 = arith.addf %15, %17 : vector<128x128xf32>
      %cst_17 = arith.constant 0.000000e+00 : f32
      %19 = vector.broadcast %cst_17 : f32 to vector<128x128xf32>
      %20 = arith.maximumf %18, %19 : vector<128x128xf32>
      %c0_18 = arith.constant 0 : index
      %c0_19 = arith.constant 0 : index
      %21 = vector.load %arg6[%c0_18, %c0_19] : memref<128x128xf32, #tpu.memory_space<vmem>>, vector<128x128xf32>
      tpu.vector_store %arg6[%c0_18, %c0_19], %20 {strides = array<i32>} : memref<128x128xf32, #tpu.memory_space<vmem>>, vector<128x128xf32>,
    } else {
    }
    return
  }
  func.func @transform_0(%arg0: i32, %arg1: i32) -> (i32, i32) {
    %c0_i32 = arith.constant 0 : i32
    return %arg0, %arg1 : i32, i32
  }
  func.func @transform_1(%arg0: i32, %arg1: i32) -> (i32, i32) {
    %c0_i32 = arith.constant 0 : i32
    %c0_i32_0 = arith.constant 0 : i32
    return %arg1, %c0_i32 : i32, i32
  }
  func.func @transform_2(%arg0: i32, %arg1: i32) -> (i32, i32) {
    %c0_i32 = arith.constant 0 : i32
    %c0_i32_0 = arith.constant 0 : i32
    %c0_i32_1 = arith.constant 0 : i32
    return %c0_i32, %c0_i32_0 : i32, i32
  }
  func.func @transform_3(%arg0: i32, %arg1: i32) -> (i32, i32) {
    %c0_i32 = arith.constant 0 : i32
    %c0_i32_0 = arith.constant 0 : i32
    %c0_i32_1 = arith.constant 0 : i32
    return %c0_i32, %c0_i32_0 : i32, i32
  }
  func.func @transform_4(%arg0: i32, %arg1: i32) -> (i32, i32) {
    %c0_i32 = arith.constant 0 : i32
    %c0_i32_0 = arith.constant 0 : i32
    return %arg0, %c0_i32 : i32, i32
  }
}

</mosaic_0001>

<bundles_post_ra>
// kernel: gcn_layer.1
= control target key start
LH: loop header
LB: loop body
LE: loop exit
PB: predicated region body
PF: predicated region fallthrough
CT: control target
= control target key end

     0   :  { %s624_s1 = inlined_call_operand.vmem [shape: f32[128,128], index: 1, kind: input, shape index: {}]   ;;  %s625_s0 = inlined_call_operand.vmem [shape: bf16[128,128], index: 0, kind: input, shape index: {}]   ;;  %s626_s2 = inlined_call_operand.vmem [shape: f32[128,128], index: 2, kind: input, shape index: {}]   ;;  %s627_s3 = inlined_call_operand.vmem [shape: f32[1,128], index: 3, kind: input, shape index: {}]   ;;  %s628_s4 = inlined_call_operand.vmem [shape: f32[128,128], index: 4, kind: output, shape index: {}]  }
   0x1   :  { %v100_v0 = vld [vmem:[%s624_s1 + $0x78] sm:$0xff]  ;;  %v99_v1 = vld [vmem:[%s624_s1 + $0x70] sm:$0xff]  ;;  %v98_v2 = vld [vmem:[%s624_s1 + $0x68] sm:$0xff] }
   0x2   :  { %377 = vmatpush.msra.mxu2 %v100_v0  ;;  %101 = vmatpush.msra.mxu0 %v100_v0  ;;  %v97_v3 = vld [vmem:[%s624_s1 + $0x60] sm:$0xff]  ;;  %v96_v4 = vld [vmem:[%s624_s1 + $0x58] sm:$0xff]  ;;  %v95_v5 = vld [vmem:[%s624_s1 + $0x50] sm:$0xff] }
   0x3   :  { %v94_v6 = vld [vmem:[%s624_s1 + $0x48] sm:$0xff]  ;;  %v93_v7 = vld [vmem:[%s624_s1 + $0x40] sm:$0xff]  ;;  %v92_v8 = vld [vmem:[%s624_s1 + $0x38] sm:$0xff] }
   0x4   :  { %378 = vmatpush.msra.mxu2 %v99_v1  ;;  %102 = vmatpush.msra.mxu0 %v99_v1  ;;  %v91_v9 = vld [vmem:[%s624_s1 + $0x30] sm:$0xff]  ;;  %v90_v10 = vld [vmem:[%s624_s1 + $0x28] sm:$0xff]  ;;  %v89_v11 = vld [vmem:[%s624_s1 + $0x20] sm:$0xff] }
   0x5   :  { %v88_v12 = vld [vmem:[%s624_s1 + $0x18] sm:$0xff]  ;;  %v87_v13 = vld [vmem:[%s624_s1 + $0x10] sm:$0xff]  ;;  %v373_v14 = vld [vmem:[%s625_s0 + $0x20] sm:$0xff]  }
   0x6   :  { %379 = vmatpush.msra.mxu2 %v98_v2  ;;  %103 = vmatpush.msra.mxu0 %v98_v2  ;;  %v339_v15 = vld [vmem:[%s625_s0] sm:$0xff]   ;;  %v86_v16 = vld [vmem:[%s624_s1 + $0x8] sm:$0xff]  ;;  %v356_v18 = vunpack.c.l.bf16 %v373_v14  ;;  %v357_v20 = vunpack.c.h.bf16 %v373_v14  ;;  %v232_v28 = vld [vmem:[%s626_s2 + $0x78] sm:$0xff] }
   0x7   :  { %v85_v17 = vld [vmem:[%s624_s1] sm:$0xff]  ;;  %v340_v19 = vunpack.c.l.bf16 %v339_v15  ;;  %v341_v21 = vunpack.c.h.bf16 %v339_v15  ;;  %v374_v22 = vld [vmem:[%s625_s0 + $0x28] sm:$0xff]   ;;  %v231_v29 = vld [vmem:[%s626_s2 + $0x70] sm:$0xff]  ;;  %393 = vmatpush.msra.mxu3 %v232_v28  ;;  %237 = vmatpush.msra.mxu1 %v232_v28 }
   0x8   :  { %380 = vmatpush.msra.mxu2 %v97_v3  ;;  %104 = vmatpush.msra.mxu0 %v97_v3  ;;  %v370_v23 = vld [vmem:[%s625_s0 + $0x8] sm:$0xff]   ;;  %v360_v24 = vunpack.c.l.bf16 %v374_v22  ;;  %v361_v26 = vunpack.c.h.bf16 %v374_v22  ;;  %v375_v30 = vld [vmem:[%s625_s0 + $0x30] sm:$0xff]   ;;  %v229_v35 = vld [vmem:[%s626_s2 + $0x60] sm:$0xff] }
   0x9   :  { %v344_v25 = vunpack.c.l.bf16 %v370_v23  ;;  %v345_v27 = vunpack.c.h.bf16 %v370_v23  ;;  %v371_v31 = vld [vmem:[%s625_s0 + $0x10] sm:$0xff]   ;;  %v230_v32 = vld [vmem:[%s626_s2 + $0x68] sm:$0xff]  ;;  %394 = vmatpush.msra.mxu3 %v231_v29  ;;  %238 = vmatpush.msra.mxu1 %v231_v29  ;;  %v364_v33 = vunpack.c.l.bf16 %v375_v30  ;;  %v228_v36 = vld [vmem:[%s626_s2 + $0x58] sm:$0xff]  ;;  %v365_v39 = vunpack.c.h.bf16 %v375_v30 }
   0xa   :  { %381 = vmatpush.msra.mxu2 %v96_v4  ;;  %105 = vmatpush.msra.mxu0 %v96_v4  ;;  %v348_v34 = vunpack.c.l.bf16 %v371_v31  ;;  %v227_v37 = vld [vmem:[%s626_s2 + $0x50] sm:$0xff]  ;;  %v226_v38 = vld [vmem:[%s626_s2 + $0x48] sm:$0xff]  ;;  %v349_v40 = vunpack.c.h.bf16 %v371_v31  ;;  %v225_v41 = vld [vmem:[%s626_s2 + $0x40] sm:$0xff] }
   0xb   :  { %395 = vmatpush.msra.mxu3 %v230_v32  ;;  %239 = vmatpush.msra.mxu1 %v230_v32  ;;  %v224_v42 = vld [vmem:[%s626_s2 + $0x38] sm:$0xff]  ;;  %v223_v43 = vld [vmem:[%s626_s2 + $0x30] sm:$0xff]  ;;  %v222_v46 = vld [vmem:[%s626_s2 + $0x28] sm:$0xff] }
   0xc   :  { %382 = vmatpush.msra.mxu2 %v95_v5  ;;  %106 = vmatpush.msra.mxu0 %v95_v5  ;;  %v376_v44 = vld [vmem:[%s625_s0 + $0x38] sm:$0xff]   ;;  %v221_v49 = vld [vmem:[%s626_s2 + $0x20] sm:$0xff]  ;;  %v219_v51 = vld [vmem:[%s626_s2 + $0x10] sm:$0xff] }
   0xd   :  { %396 = vmatpush.msra.mxu3 %v229_v35  ;;  %240 = vmatpush.msra.mxu1 %v229_v35  ;;  %v372_v45 = vld [vmem:[%s625_s0 + $0x18] sm:$0xff]   ;;  %v368_v47 = vunpack.c.l.bf16 %v376_v44  ;;  %v218_v52 = vld [vmem:[%s626_s2 + $0x8] sm:$0xff]  ;;  %v369_v53 = vunpack.c.h.bf16 %v376_v44  ;;  %v217_v55 = vld [vmem:[%s626_s2] sm:$0xff] }
   0xe   :  { %383 = vmatpush.msra.mxu2 %v94_v6  ;;  %107 = vmatpush.msra.mxu0 %v94_v6  ;;  %v352_v48 = vunpack.c.l.bf16 %v372_v45  ;;  %v220_v50 = vld [vmem:[%s626_s2 + $0x18] sm:$0xff]  ;;  %v353_v54 = vunpack.c.h.bf16 %v372_v45 }
   0xf   :  { %397 = vmatpush.msra.mxu3 %v228_v36  ;;  %241 = vmatpush.msra.mxu1 %v228_v36 }
  0x10   :  { %384 = vmatpush.msra.mxu2 %v93_v7  ;;  %108 = vmatpush.msra.mxu0 %v93_v7 }
  0x11   :  { %398 = vmatpush.msra.mxu3 %v227_v37  ;;  %242 = vmatpush.msra.mxu1 %v227_v37 }
  0x12   :  { %385 = vmatpush.msra.mxu2 %v92_v8  ;;  %109 = vmatpush.msra.mxu0 %v92_v8  ;;  %v558_v8 = vld [vmem:[%s627_s3] ss:$0 sm:$0xff] }
  0x13   :  { %399 = vmatpush.msra.mxu3 %v226_v38  ;;  %243 = vmatpush.msra.mxu1 %v226_v38 }
  0x14   :  { %386 = vmatpush.msra.mxu2 %v91_v9  ;;  %110 = vmatpush.msra.mxu0 %v91_v9 }
  0x15   :  { %400 = vmatpush.msra.mxu3 %v225_v41  ;;  %244 = vmatpush.msra.mxu1 %v225_v41 }
  0x16   :  { %387 = vmatpush.msra.mxu2 %v90_v10  ;;  %111 = vmatpush.msra.mxu0 %v90_v10 }
  0x17   :  { %401 = vmatpush.msra.mxu3 %v224_v42  ;;  %245 = vmatpush.msra.mxu1 %v224_v42 }
  0x18   :  { %388 = vmatpush.msra.mxu2 %v89_v11  ;;  %112 = vmatpush.msra.mxu0 %v89_v11 }
  0x19   :  { %402 = vmatpush.msra.mxu3 %v223_v43  ;;  %246 = vmatpush.msra.mxu1 %v223_v43 }
  0x1a   :  { %389 = vmatpush.msra.mxu2 %v88_v12  ;;  %113 = vmatpush.msra.mxu0 %v88_v12 }
  0x1b   :  { %403 = vmatpush.msra.mxu3 %v222_v46  ;;  %247 = vmatpush.msra.mxu1 %v222_v46 }
  0x1c   :  { %390 = vmatpush.msra.mxu2 %v87_v13  ;;  %114 = vmatpush.msra.mxu0 %v87_v13 }
  0x1d   :  { %404 = vmatpush.msra.mxu3 %v221_v49  ;;  %248 = vmatpush.msra.mxu1 %v221_v49 }
  0x1e   :  { %391 = vmatpush.msra.mxu2 %v86_v16  ;;  %115 = vmatpush.msra.mxu0 %v86_v16 }
  0x1f   :  { %405 = vmatpush.msra.mxu3 %v220_v50  ;;  %249 = vmatpush.msra.mxu1 %v220_v50 }
  0x20   :  { %392 = vmatpush.msra.mxu2 %v85_v17  ;;  %116 = vmatpush.msra.mxu0 %v85_v17 }
  0x21   :  { %141 = vmatmul.f32.vlgmr.msra.gmra.mxu2 %v356_v18  ;;  %117 = vmatmul.f32.vlgmr.msra.gmra.mxu0 %v340_v19 }
  0x22   :  { %406 = vmatpush.msra.mxu3 %v219_v51  ;;  %250 = vmatpush.msra.mxu1 %v219_v51 }
  0x24   :  { %407 = vmatpush.msra.mxu3 %v218_v52  ;;  %251 = vmatpush.msra.mxu1 %v218_v52 }
  0x26   :  { %408 = vmatpush.msra.mxu3 %v217_v55  ;;  %252 = vmatpush.msra.mxu1 %v217_v55 }
  0x29   :  { %144 = vmatmul.f32.gmra.mxu2 %v357_v20  ;;  %120 = vmatmul.f32.gmra.mxu0 %v341_v21 }
  0x31   :  { %147 = vmatmul.f32.gmra.mxu2 %v360_v24  ;;  %123 = vmatmul.f32.gmra.mxu0 %v344_v25 }
  0x39   :  { %150 = vmatmul.f32.gmra.mxu2 %v361_v26  ;;  %126 = vmatmul.f32.gmra.mxu0 %v345_v27 }
  0x41   :  { %153 = vmatmul.f32.gmra.mxu2 %v364_v33  ;;  %129 = vmatmul.f32.gmra.mxu0 %v348_v34 }
  0x49   :  { %156 = vmatmul.f32.gmra.mxu2 %v365_v39  ;;  %132 = vmatmul.f32.gmra.mxu0 %v349_v40 }
  0x51   :  { %159 = vmatmul.f32.gmra.mxu2 %v368_v47  ;;  %135 = vmatmul.f32.gmra.mxu0 %v352_v48 }
  0x59   :  { %162 = vmatmul.f32.gmra.mxu2 %v369_v53  ;;  %138 = vmatmul.f32.gmra.mxu0 %v353_v54 }
  0x9e   :  { %v118_v56 = vpop.f32.mrf.mxu0 }
  0x9f   :  { %253 = vmatmul.f32.vlgmr.msra.gmra.mxu1 %v118_v56 }
  0xa4   :  { %v142_v57 = vpop.f32.mrf.mxu2 }
  0xa5   :  { %277 = vmatmul.f32.vlgmr.msra.gmra.mxu3 %v142_v57 }
  0xa6   :  { %v121_v58 = vpop.f32.mrf.mxu0 }
  0xa7   :  { %256 = vmatmul.f32.gmra.mxu1 %v121_v58 }
  0xac   :  { %v145_v59 = vpop.f32.mrf.mxu2 }
  0xad   :  { %280 = vmatmul.f32.gmra.mxu3 %v145_v59 }
  0xae   :  { %v124_v60 = vpop.f32.mrf.mxu0 }
  0xaf   :  { %259 = vmatmul.f32.gmra.mxu1 %v124_v60 }
  0xb4   :  { %v148_v61 = vpop.f32.mrf.mxu2 }
  0xb5   :  { %283 = vmatmul.f32.gmra.mxu3 %v148_v61 }
  0xb6   :  { %v127_v62 = vpop.f32.mrf.mxu0 }
  0xb7   :  { %262 = vmatmul.f32.gmra.mxu1 %v127_v62 }
  0xbc   :  { %v151_v63 = vpop.f32.mrf.mxu2 }
  0xbd   :  { %286 = vmatmul.f32.gmra.mxu3 %v151_v63 }
  0xbe   :  { %v130_v0 = vpop.f32.mrf.mxu0 }
  0xbf   :  { %265 = vmatmul.f32.gmra.mxu1 %v130_v0 }
  0xc4   :  { %v154_v1 = vpop.f32.mrf.mxu2 }
  0xc5   :  { %289 = vmatmul.f32.gmra.mxu3 %v154_v1 }
  0xc6   :  { %v133_v2 = vpop.f32.mrf.mxu0 }
  0xc7   :  { %268 = vmatmul.f32.gmra.mxu1 %v133_v2 }
  0xcc   :  { %v157_v3 = vpop.f32.mrf.mxu2 }
  0xcd   :  { %292 = vmatmul.f32.gmra.mxu3 %v157_v3 }
  0xce   :  { %v136_v4 = vpop.f32.mrf.mxu0 }
  0xcf   :  { %271 = vmatmul.f32.gmra.mxu1 %v136_v4 }
  0xd4   :  { %v160_v5 = vpop.f32.mrf.mxu2 }
  0xd5   :  { %295 = vmatmul.f32.gmra.mxu3 %v160_v5 }
  0xd6   :  { %v139_v6 = vpop.f32.mrf.mxu0 }
  0xd7   :  { %274 = vmatmul.f32.gmra.mxu1 %v139_v6 }
  0xdc   :  { %v163_v7 = vpop.f32.mrf.mxu2 }
  0xdd   :  { %298 = vmatmul.f32.gmra.mxu3 %v163_v7 }
 0x11c   :  { %v254_v9 = vpop.f32.mrf.mxu1 }
 0x11d   :  { %v255_v10 = vadd.f32 %v558_v8, %v254_v9 }
 0x11f   :  { %v302_v11 = vmax.f32 %v255_v10, 0.0 }
 0x121   :  { %318 = vst [vmem:[%s628_s4] sm:$0xff] %v302_v11 }
 0x124   :  { %v257_v12 = vpop.f32.mrf.mxu1 }
 0x125   :  { %v258_v13 = vadd.f32 %v558_v8, %v257_v12 }
 0x127   :  { %v303_v14 = vmax.f32 %v258_v13, 0.0 }
 0x128   :  { %v278_v15 = vpop.f32.mrf.mxu3 }
 0x129   :  { %v279_v16 = vadd.f32 %v558_v8, %v278_v15  ;;  %319 = vst [vmem:[%s628_s4 + $0x8] sm:$0xff] %v303_v14 }
 0x12b   :  { %v310_v17 = vmax.f32 %v279_v16, 0.0 }
 0x12c   :  { %v260_v18 = vpop.f32.mrf.mxu1 }
 0x12d   :  { %326 = vst [vmem:[%s628_s4 + $0x40] sm:$0xff] %v310_v17  ;;  %v261_v19 = vadd.f32 %v558_v8, %v260_v18 }
 0x12f   :  { %v304_v20 = vmax.f32 %v261_v19, 0.0 }
 0x130   :  { %v281_v21 = vpop.f32.mrf.mxu3 }
 0x131   :  { %v282_v22 = vadd.f32 %v558_v8, %v281_v21  ;;  %320 = vst [vmem:[%s628_s4 + $0x10] sm:$0xff] %v304_v20 }
 0x133   :  { %v311_v23 = vmax.f32 %v282_v22, 0.0 }
 0x134   :  { %v263_v24 = vpop.f32.mrf.mxu1 }
 0x135   :  { %327 = vst [vmem:[%s628_s4 + $0x48] sm:$0xff] %v311_v23  ;;  %v264_v25 = vadd.f32 %v558_v8, %v263_v24 }
 0x137   :  { %v305_v26 = vmax.f32 %v264_v25, 0.0 }
 0x138   :  { %v284_v27 = vpop.f32.mrf.mxu3 }
 0x139   :  { %v285_v28 = vadd.f32 %v558_v8, %v284_v27  ;;  %321 = vst [vmem:[%s628_s4 + $0x18] sm:$0xff] %v305_v26 }
 0x13b   :  { %v312_v29 = vmax.f32 %v285_v28, 0.0 }
 0x13c   :  { %v266_v30 = vpop.f32.mrf.mxu1 }
 0x13d   :  { %328 = vst [vmem:[%s628_s4 + $0x50] sm:$0xff] %v312_v29  ;;  %v267_v31 = vadd.f32 %v558_v8, %v266_v30 }
 0x13f   :  { %v306_v32 = vmax.f32 %v267_v31, 0.0 }
 0x140   :  { %v287_v33 = vpop.f32.mrf.mxu3 }
 0x141   :  { %v288_v34 = vadd.f32 %v558_v8, %v287_v33  ;;  %322 = vst [vmem:[%s628_s4 + $0x20] sm:$0xff] %v306_v32 }
 0x143   :  { %v313_v35 = vmax.f32 %v288_v34, 0.0 }
 0x144   :  { %v269_v36 = vpop.f32.mrf.mxu1 }
 0x145   :  { %329 = vst [vmem:[%s628_s4 + $0x58] sm:$0xff] %v313_v35  ;;  %v270_v37 = vadd.f32 %v558_v8, %v269_v36 }
 0x147   :  { %v307_v38 = vmax.f32 %v270_v37, 0.0 }
 0x148   :  { %v290_v39 = vpop.f32.mrf.mxu3 }
 0x149   :  { %v291_v40 = vadd.f32 %v558_v8, %v290_v39  ;;  %323 = vst [vmem:[%s628_s4 + $0x28] sm:$0xff] %v307_v38 }
 0x14b   :  { %v314_v41 = vmax.f32 %v291_v40, 0.0 }
 0x14c   :  { %v272_v42 = vpop.f32.mrf.mxu1 }
 0x14d   :  { %330 = vst [vmem:[%s628_s4 + $0x60] sm:$0xff] %v314_v41  ;;  %v273_v43 = vadd.f32 %v558_v8, %v272_v42 }
 0x14f   :  { %v308_v44 = vmax.f32 %v273_v43, 0.0 }
 0x150   :  { %v293_v45 = vpop.f32.mrf.mxu3 }
 0x151   :  { %v294_v46 = vadd.f32 %v558_v8, %v293_v45  ;;  %324 = vst [vmem:[%s628_s4 + $0x30] sm:$0xff] %v308_v44 }
 0x153   :  { %v315_v47 = vmax.f32 %v294_v46, 0.0 }
 0x154   :  { %v275_v48 = vpop.f32.mrf.mxu1 }
 0x155   :  { %331 = vst [vmem:[%s628_s4 + $0x68] sm:$0xff] %v315_v47  ;;  %v276_v49 = vadd.f32 %v558_v8, %v275_v48 }
 0x157   :  { %v309_v50 = vmax.f32 %v276_v49, 0.0 }
 0x158   :  { %v296_v51 = vpop.f32.mrf.mxu3 }
 0x159   :  { %v297_v52 = vadd.f32 %v558_v8, %v296_v51  ;;  %325 = vst [vmem:[%s628_s4 + $0x38] sm:$0xff] %v309_v50 }
 0x15b   :  { %v316_v53 = vmax.f32 %v297_v52, 0.0 }
 0x15d   :  { %332 = vst [vmem:[%s628_s4 + $0x70] sm:$0xff] %v316_v53 }
 0x160   :  { %v299_v54 = vpop.f32.mrf.mxu3 }
 0x161   :  { %v300_v55 = vadd.f32 %v558_v8, %v299_v54 }
 0x163   :  { %v317_v56 = vmax.f32 %v300_v55, 0.0 }
 0x165   :  { %333 = vst [vmem:[%s628_s4 + $0x78] sm:$0xff] %v317_v56 }

</bundles_post_ra>
